<compile_context>
chip_gen: v6e
topology: v6e:2x2x1
jax: 0.10.0
libtpu: 0.0.40
codegen_flags: <defaults>
</compile_context>

<pallas_src>
import jax
import jax.numpy as jnp
from jax import lax
from jax.experimental import pallas as pl
from jax.experimental.pallas import tpu as pltpu


def _embedding_gather_kernel(idx_ref, table_ref, out_ref):
    # idx_ref:   (M,)  int32   in SMEM (scalar-prefetch)
    # table_ref: (N, D) float32 in VMEM (tiny: 18*32*4 B = 2.25 KB)
    # out_ref:   (M, D) float32 in VMEM
    m = out_ref.shape[0]

    def body(i, carry):
        idx = idx_ref[i]                                      # scalar from SMEM
        out_ref[pl.ds(i, 1), :] = table_ref[pl.ds(idx, 1), :]  # row copy
        return carry

    # Short fixed trip-count: fully unroll so the LLO scheduler sees all
    # loads/stores and can interleave them.
    lax.fori_loop(0, m, body, 0, unroll=True)


def embedding_forward(action, table):
    """action: (B, S) int, table: (N, D) float32 -> (B, S, D) float32."""
    B, S = action.shape
    N, D = table.shape
    M = B * S

    # Clamp like a JAX gather would (torch raises on OOB); guarantees the
    # dynamic VMEM row read stays in-bounds.
    idx_flat = jnp.clip(action.reshape(M), 0, N - 1).astype(jnp.int32)

    out = pl.pallas_call(
        _embedding_gather_kernel,
        out_shape=jax.ShapeDtypeStruct((M, D), jnp.float32),
        grid_spec=pltpu.PrefetchScalarGridSpec(
            num_scalar_prefetch=1,           # idx_flat -> SMEM
            grid=(1,),                       # single step: 2 KB gather
            in_specs=[
                pl.BlockSpec((N, D), lambda i, idx: (0, 0)),   # whole table
            ],
            out_specs=pl.BlockSpec((M, D), lambda i, idx: (0, 0)),
        ),
        compiler_params=pltpu.CompilerParams(
            dimension_semantics=("arbitrary",)),
    )(idx_flat, table)

    return out.reshape(B, S, D)


def init_embedding_table(key, num_embeddings=18, embedding_dim=32):
    # torch.nn.Embedding default init: N(0, 1)
    return jax.random.normal(key, (num_embeddings, embedding_dim),
                             dtype=jnp.float32)


if __name__ == "__main__":
    num_embeddings, embedding_dim = 18, 32
    B, S = 2, 8

    key = jax.random.PRNGKey(0)
    k_table, k_idx = jax.random.split(key)

    table = init_embedding_table(k_table, num_embeddings, embedding_dim)
    action = jax.random.randint(k_idx, (B, S), 0, num_embeddings,
                                dtype=jnp.int32)

    out = embedding_forward(action, table)
    out = jax.block_until_ready(out)

    # Reference check against plain JAX gather (== torch emb(action)).
    ref = table[action]
    assert out.shape == (B, S, embedding_dim)
    assert jnp.array_equal(out, ref)   # direct row copy -> bit-exact

    print("KERNEL_OK")
</pallas_src>

<mosaic_0001>
module attributes {stable_mosaic.version = 11 : i64} {
  func.func @_embedding_gather_kernel(%arg0: i32, %arg1: memref<16xi32, #tpu.memory_space<smem>>, %arg2: memref<18x32xf32, #tpu.memory_space<vmem>>, %arg3: memref<16x32xf32, #tpu.memory_space<vmem>>) attributes {dimension_semantics = [#tpu.dimension_semantics<arbitrary>], iteration_bounds = array<i64: 1>, scalar_prefetch = 1 : i64, scratch_operands = 0 : i64, tpu.core_type = #tpu.core_type<tc>, window_params = [{pipeline_mode = #tpu.pipeline_mode<synchronous>, transform_indices = @transform_0, window_bounds = array<i64: 18, 32>}, {pipeline_mode = #tpu.pipeline_mode<synchronous>, transform_indices = @transform_1, window_bounds = array<i64: 16, 32>}]} {
    %c0_i32 = arith.constant 0 : i32
    %0 = arith.index_cast %c0_i32 : i32 to index
    %1 = memref.load %arg1[%0] : memref<16xi32, #tpu.memory_space<smem>>
    %2 = arith.index_cast %1 : i32 to index
    %c0 = arith.constant 0 : index
    %3 = vector.load %arg2[%2, %c0] : memref<18x32xf32, #tpu.memory_space<vmem>>, vector<1x32xf32>
    %4 = arith.index_cast %c0_i32 : i32 to index
    %c0_0 = arith.constant 0 : index
    %5 = vector.load %arg3[%4, %c0_0] : memref<16x32xf32, #tpu.memory_space<vmem>>, vector<1x32xf32>
    tpu.vector_store %arg3[%4, %c0_0], %3 {strides = array<i32>} : memref<16x32xf32, #tpu.memory_space<vmem>>, vector<1x32xf32>,
    %c1_i32 = arith.constant 1 : i32
    %6 = arith.index_cast %c1_i32 : i32 to index
    %7 = memref.load %arg1[%6] : memref<16xi32, #tpu.memory_space<smem>>
    %8 = arith.index_cast %7 : i32 to index
    %c0_1 = arith.constant 0 : index
    %9 = vector.load %arg2[%8, %c0_1] : memref<18x32xf32, #tpu.memory_space<vmem>>, vector<1x32xf32>
    %10 = arith.index_cast %c1_i32 : i32 to index
    %c0_2 = arith.constant 0 : index
    %11 = vector.load %arg3[%10, %c0_2] : memref<16x32xf32, #tpu.memory_space<vmem>>, vector<1x32xf32>
    tpu.vector_store %arg3[%10, %c0_2], %9 {strides = array<i32>} : memref<16x32xf32, #tpu.memory_space<vmem>>, vector<1x32xf32>,
    %c2_i32 = arith.constant 2 : i32
    %12 = arith.index_cast %c2_i32 : i32 to index
    %13 = memref.load %arg1[%12] : memref<16xi32, #tpu.memory_space<smem>>
    %14 = arith.index_cast %13 : i32 to index
    %c0_3 = arith.constant 0 : index
    %15 = vector.load %arg2[%14, %c0_3] : memref<18x32xf32, #tpu.memory_space<vmem>>, vector<1x32xf32>
    %16 = arith.index_cast %c2_i32 : i32 to index
    %c0_4 = arith.constant 0 : index
    %17 = vector.load %arg3[%16, %c0_4] : memref<16x32xf32, #tpu.memory_space<vmem>>, vector<1x32xf32>
    tpu.vector_store %arg3[%16, %c0_4], %15 {strides = array<i32>} : memref<16x32xf32, #tpu.memory_space<vmem>>, vector<1x32xf32>,
    %c3_i32 = arith.constant 3 : i32
    %18 = arith.index_cast %c3_i32 : i32 to index
    %19 = memref.load %arg1[%18] : memref<16xi32, #tpu.memory_space<smem>>
    %20 = arith.index_cast %19 : i32 to index
    %c0_5 = arith.constant 0 : index
    %21 = vector.load %arg2[%20, %c0_5] : memref<18x32xf32, #tpu.memory_space<vmem>>, vector<1x32xf32>
    %22 = arith.index_cast %c3_i32 : i32 to index
    %c0_6 = arith.constant 0 : index
    %23 = vector.load %arg3[%22, %c0_6] : memref<16x32xf32, #tpu.memory_space<vmem>>, vector<1x32xf32>
    tpu.vector_store %arg3[%22, %c0_6], %21 {strides = array<i32>} : memref<16x32xf32, #tpu.memory_space<vmem>>, vector<1x32xf32>,
    %c4_i32 = arith.constant 4 : i32
    %24 = arith.index_cast %c4_i32 : i32 to index
    %25 = memref.load %arg1[%24] : memref<16xi32, #tpu.memory_space<smem>>
    %26 = arith.index_cast %25 : i32 to index
    %c0_7 = arith.constant 0 : index
    %27 = vector.load %arg2[%26, %c0_7] : memref<18x32xf32, #tpu.memory_space<vmem>>, vector<1x32xf32>
    %28 = arith.index_cast %c4_i32 : i32 to index
    %c0_8 = arith.constant 0 : index
    %29 = vector.load %arg3[%28, %c0_8] : memref<16x32xf32, #tpu.memory_space<vmem>>, vector<1x32xf32>
    tpu.vector_store %arg3[%28, %c0_8], %27 {strides = array<i32>} : memref<16x32xf32, #tpu.memory_space<vmem>>, vector<1x32xf32>,
    %c5_i32 = arith.constant 5 : i32
    %30 = arith.index_cast %c5_i32 : i32 to index
    %31 = memref.load %arg1[%30] : memref<16xi32, #tpu.memory_space<smem>>
    %32 = arith.index_cast %31 : i32 to index
    %c0_9 = arith.constant 0 : index
    %33 = vector.load %arg2[%32, %c0_9] : memref<18x32xf32, #tpu.memory_space<vmem>>, vector<1x32xf32>
    %34 = arith.index_cast %c5_i32 : i32 to index
    %c0_10 = arith.constant 0 : index
    %35 = vector.load %arg3[%34, %c0_10] : memref<16x32xf32, #tpu.memory_space<vmem>>, vector<1x32xf32>
    tpu.vector_store %arg3[%34, %c0_10], %33 {strides = array<i32>} : memref<16x32xf32, #tpu.memory_space<vmem>>, vector<1x32xf32>,
    %c6_i32 = arith.constant 6 : i32
    %36 = arith.index_cast %c6_i32 : i32 to index
    %37 = memref.load %arg1[%36] : memref<16xi32, #tpu.memory_space<smem>>
    %38 = arith.index_cast %37 : i32 to index
    %c0_11 = arith.constant 0 : index
    %39 = vector.load %arg2[%38, %c0_11] : memref<18x32xf32, #tpu.memory_space<vmem>>, vector<1x32xf32>
    %40 = arith.index_cast %c6_i32 : i32 to index
    %c0_12 = arith.constant 0 : index
    %41 = vector.load %arg3[%40, %c0_12] : memref<16x32xf32, #tpu.memory_space<vmem>>, vector<1x32xf32>
    tpu.vector_store %arg3[%40, %c0_12], %39 {strides = array<i32>} : memref<16x32xf32, #tpu.memory_space<vmem>>, vector<1x32xf32>,
    %c7_i32 = arith.constant 7 : i32
    %42 = arith.index_cast %c7_i32 : i32 to index
    %43 = memref.load %arg1[%42] : memref<16xi32, #tpu.memory_space<smem>>
    %44 = arith.index_cast %43 : i32 to index
    %c0_13 = arith.constant 0 : index
    %45 = vector.load %arg2[%44, %c0_13] : memref<18x32xf32, #tpu.memory_space<vmem>>, vector<1x32xf32>
    %46 = arith.index_cast %c7_i32 : i32 to index
    %c0_14 = arith.constant 0 : index
    %47 = vector.load %arg3[%46, %c0_14] : memref<16x32xf32, #tpu.memory_space<vmem>>, vector<1x32xf32>
    tpu.vector_store %arg3[%46, %c0_14], %45 {strides = array<i32>} : memref<16x32xf32, #tpu.memory_space<vmem>>, vector<1x32xf32>,
    %c8_i32 = arith.constant 8 : i32
    %48 = arith.index_cast %c8_i32 : i32 to index
    %49 = memref.load %arg1[%48] : memref<16xi32, #tpu.memory_space<smem>>
    %50 = arith.index_cast %49 : i32 to index
    %c0_15 = arith.constant 0 : index
    %51 = vector.load %arg2[%50, %c0_15] : memref<18x32xf32, #tpu.memory_space<vmem>>, vector<1x32xf32>
    %52 = arith.index_cast %c8_i32 : i32 to index
    %c0_16 = arith.constant 0 : index
    %53 = vector.load %arg3[%52, %c0_16] : memref<16x32xf32, #tpu.memory_space<vmem>>, vector<1x32xf32>
    tpu.vector_store %arg3[%52, %c0_16], %51 {strides = array<i32>} : memref<16x32xf32, #tpu.memory_space<vmem>>, vector<1x32xf32>,
    %c9_i32 = arith.constant 9 : i32
    %54 = arith.index_cast %c9_i32 : i32 to index
    %55 = memref.load %arg1[%54] : memref<16xi32, #tpu.memory_space<smem>>
    %56 = arith.index_cast %55 : i32 to index
    %c0_17 = arith.constant 0 : index
    %57 = vector.load %arg2[%56, %c0_17] : memref<18x32xf32, #tpu.memory_space<vmem>>, vector<1x32xf32>
    %58 = arith.index_cast %c9_i32 : i32 to index
    %c0_18 = arith.constant 0 : index
    %59 = vector.load %arg3[%58, %c0_18] : memref<16x32xf32, #tpu.memory_space<vmem>>, vector<1x32xf32>
    tpu.vector_store %arg3[%58, %c0_18], %57 {strides = array<i32>} : memref<16x32xf32, #tpu.memory_space<vmem>>, vector<1x32xf32>,
    %c10_i32 = arith.constant 10 : i32
    %60 = arith.index_cast %c10_i32 : i32 to index
    %61 = memref.load %arg1[%60] : memref<16xi32, #tpu.memory_space<smem>>
    %62 = arith.index_cast %61 : i32 to index
    %c0_19 = arith.constant 0 : index
    %63 = vector.load %arg2[%62, %c0_19] : memref<18x32xf32, #tpu.memory_space<vmem>>, vector<1x32xf32>
    %64 = arith.index_cast %c10_i32 : i32 to index
    %c0_20 = arith.constant 0 : index
    %65 = vector.load %arg3[%64, %c0_20] : memref<16x32xf32, #tpu.memory_space<vmem>>, vector<1x32xf32>
    tpu.vector_store %arg3[%64, %c0_20], %63 {strides = array<i32>} : memref<16x32xf32, #tpu.memory_space<vmem>>, vector<1x32xf32>,
    %c11_i32 = arith.constant 11 : i32
    %66 = arith.index_cast %c11_i32 : i32 to index
    %67 = memref.load %arg1[%66] : memref<16xi32, #tpu.memory_space<smem>>
    %68 = arith.index_cast %67 : i32 to index
    %c0_21 = arith.constant 0 : index
    %69 = vector.load %arg2[%68, %c0_21] : memref<18x32xf32, #tpu.memory_space<vmem>>, vector<1x32xf32>
    %70 = arith.index_cast %c11_i32 : i32 to index
    %c0_22 = arith.constant 0 : index
    %71 = vector.load %arg3[%70, %c0_22] : memref<16x32xf32, #tpu.memory_space<vmem>>, vector<1x32xf32>
    tpu.vector_store %arg3[%70, %c0_22], %69 {strides = array<i32>} : memref<16x32xf32, #tpu.memory_space<vmem>>, vector<1x32xf32>,
    %c12_i32 = arith.constant 12 : i32
    %72 = arith.index_cast %c12_i32 : i32 to index
    %73 = memref.load %arg1[%72] : memref<16xi32, #tpu.memory_space<smem>>
    %74 = arith.index_cast %73 : i32 to index
    %c0_23 = arith.constant 0 : index
    %75 = vector.load %arg2[%74, %c0_23] : memref<18x32xf32, #tpu.memory_space<vmem>>, vector<1x32xf32>
    %76 = arith.index_cast %c12_i32 : i32 to index
    %c0_24 = arith.constant 0 : index
    %77 = vector.load %arg3[%76, %c0_24] : memref<16x32xf32, #tpu.memory_space<vmem>>, vector<1x32xf32>
    tpu.vector_store %arg3[%76, %c0_24], %75 {strides = array<i32>} : memref<16x32xf32, #tpu.memory_space<vmem>>, vector<1x32xf32>,
    %c13_i32 = arith.constant 13 : i32
    %78 = arith.index_cast %c13_i32 : i32 to index
    %79 = memref.load %arg1[%78] : memref<16xi32, #tpu.memory_space<smem>>
    %80 = arith.index_cast %79 : i32 to index
    %c0_25 = arith.constant 0 : index
    %81 = vector.load %arg2[%80, %c0_25] : memref<18x32xf32, #tpu.memory_space<vmem>>, vector<1x32xf32>
    %82 = arith.index_cast %c13_i32 : i32 to index
    %c0_26 = arith.constant 0 : index
    %83 = vector.load %arg3[%82, %c0_26] : memref<16x32xf32, #tpu.memory_space<vmem>>, vector<1x32xf32>
    tpu.vector_store %arg3[%82, %c0_26], %81 {strides = array<i32>} : memref<16x32xf32, #tpu.memory_space<vmem>>, vector<1x32xf32>,
    %c14_i32 = arith.constant 14 : i32
    %84 = arith.index_cast %c14_i32 : i32 to index
    %85 = memref.load %arg1[%84] : memref<16xi32, #tpu.memory_space<smem>>
    %86 = arith.index_cast %85 : i32 to index
    %c0_27 = arith.constant 0 : index
    %87 = vector.load %arg2[%86, %c0_27] : memref<18x32xf32, #tpu.memory_space<vmem>>, vector<1x32xf32>
    %88 = arith.index_cast %c14_i32 : i32 to index
    %c0_28 = arith.constant 0 : index
    %89 = vector.load %arg3[%88, %c0_28] : memref<16x32xf32, #tpu.memory_space<vmem>>, vector<1x32xf32>
    tpu.vector_store %arg3[%88, %c0_28], %87 {strides = array<i32>} : memref<16x32xf32, #tpu.memory_space<vmem>>, vector<1x32xf32>,
    %c15_i32 = arith.constant 15 : i32
    %90 = arith.index_cast %c15_i32 : i32 to index
    %91 = memref.load %arg1[%90] : memref<16xi32, #tpu.memory_space<smem>>
    %92 = arith.index_cast %91 : i32 to index
    %c0_29 = arith.constant 0 : index
    %93 = vector.load %arg2[%92, %c0_29] : memref<18x32xf32, #tpu.memory_space<vmem>>, vector<1x32xf32>
    %94 = arith.index_cast %c15_i32 : i32 to index
    %c0_30 = arith.constant 0 : index
    %95 = vector.load %arg3[%94, %c0_30] : memref<16x32xf32, #tpu.memory_space<vmem>>, vector<1x32xf32>
    tpu.vector_store %arg3[%94, %c0_30], %93 {strides = array<i32>} : memref<16x32xf32, #tpu.memory_space<vmem>>, vector<1x32xf32>,
    %c16_i32 = arith.constant 16 : i32
    return
  }
  func.func @transform_0(%arg0: i32, %arg1: memref<16xi32, #tpu.memory_space<smem>>) -> (i32, i32) {
    %c0_i32 = arith.constant 0 : i32
    %c0_i32_0 = arith.constant 0 : i32
    %c0_i32_1 = arith.constant 0 : i32
    return %c0_i32, %c0_i32_0 : i32, i32
  }
  func.func @transform_1(%arg0: i32, %arg1: memref<16xi32, #tpu.memory_space<smem>>) -> (i32, i32) {
    %c0_i32 = arith.constant 0 : i32
    %c0_i32_0 = arith.constant 0 : i32
    %c0_i32_1 = arith.constant 0 : i32
    return %c0_i32, %c0_i32_0 : i32, i32
  }
}

</mosaic_0001>

<bundles_post_ra>
// kernel: tpu_custom_call.1
= control target key start
LH: loop header
LB: loop body
LE: loop exit
PB: predicated region body
PF: predicated region fallthrough
CT: control target
= control target key end

     0   :  { %s200_s9 = smov [#allocation3]   ;;  %s251_s0 = inlined_call_operand.hbm [shape: s32[16], index: 0, kind: input, shape index: {}]   ;;  %s252_s1 = inlined_call_operand.hbm [shape: f32[18,32], index: 1, kind: input, shape index: {}]   ;;  %s253_s2 = inlined_call_operand.hbm [shape: f32[16,32], index: 2, kind: output, shape index: {}]  }
   0x1   :  { %8 = dma.hbm_to_smem %s251_s0, 16, %s200_s9, [#allocation2] }
   0x2   :  { %194 = dma.done.wait [#allocation2], 16 }
   0x3   :  { %195 = vsyncadd [#allocation2], 4294967280 }
   0x4   :  { %10 = sfence }
   0x5   :  { %11 = vsyncpa [#allocation5], 0 }
   0x6   :  { %12 = vsyncpa [#allocation6], 0  ;;  %s201_s12 = smov [#allocation4]  }
   0x7   :  { %s18_s13 = sshll.u32 %s201_s12, 4  ;;  %s19_s13 = int_to_ptr.vmem [resolvable:$true] %s18_s13 }
   0x8   :  { %s162_s14 = scalar_lea.vmem %s19_s13, 384  ;;  %p167_p1 = scmp.lt.s32.totalorder %s19_s13, %s19_s13 }
   0x9   :  { %p163_p0 = scmp.ne.s32.totalorder %s19_s13, %s162_s14  ;;  %p168_p2 = scmp.lt.s32.totalorder %s162_s14, %s162_s14 }
   0xb   :  { %p169_p3 = por %p168_p2, %p167_p1 }
   0xd   :  { %p170_p4 = pnand %p169_p3, %p163_p0 }
   0xf   :  { %173 = shalt.err (!%p170_p4)
}
  0x10   :  { %s202_s15 = smov 128   ;;  %s203_s16 = smov 8  }
  0x11   :  { %24 = dma.hbm_to_vmem [thread:$0]  %s252_s1, 384, %s19_s13, [#allocation5], %s202_s15, %s202_s15, %s203_s16  }
  0x12   :  { %196 = dma.done.wait [#allocation5], 384  }
  0x13   :  { %197 = vsyncadd [#allocation5], 4294966912  ;;  %s28_s18 = sld [smem:[#allocation3]]  ;;  %vm31_vm0 = vcmask 253952  }
  0x14   :  { %s126_s19 = sld [smem:[#allocation3 + $0x1]] }
  0x15   :  { %s127_s20 = sld [smem:[#allocation3 + $0x2]] }
  0x16   :  { %s128_s21 = sld [smem:[#allocation3 + $0x3]] }
  0x17   :  { %s129_s22 = sld [smem:[#allocation3 + $0x4]] }
  0x18   :  { %s130_s23 = sld [smem:[#allocation3 + $0x5]] }
  0x19   :  { %s131_s24 = sld [smem:[#allocation3 + $0x6]]  ;;  %s29_s25 = scalar_lea.vmem [#allocation4], %s28_s18 }
  0x1a   :  { %v30_v0 = vld [vmem:[%s29_s25] sm:$0x1]  ;;  %s132_s26 = sld [smem:[#allocation3 + $0x7]]  ;;  %s34_s27 = scalar_lea.vmem [#allocation4], %s126_s19 }
  0x1b   :  { %32 = vst.msk [vmem:[#allocation7] sm:$0x1] %vm31_vm0, %v30_v0  ;;  %v35_v1 = vld [vmem:[%s34_s27] sm:$0x1]  ;;  %s133_s28 = sld [smem:[#allocation3 + $0x8]]  ;;  %s38_s1 = scalar_lea.vmem [#allocation4], %s127_s20 }
  0x1c   :  { %36 = vst.msk [vmem:[#allocation7 + $0x1] sm:$0x1] %vm31_vm0, %v35_v1  ;;  %v39_v2 = vld [vmem:[%s38_s1] sm:$0x1]  ;;  %s134_s29 = sld [smem:[#allocation3 + $0x9]]  ;;  %s42_s30 = scalar_lea.vmem [#allocation4], %s128_s21 }
  0x1d   :  { %40 = vst.msk [vmem:[#allocation7 + $0x2] sm:$0x1] %vm31_vm0, %v39_v2  ;;  %v43_v3 = vld [vmem:[%s42_s30] sm:$0x1]  ;;  %s135_s3 = sld [smem:[#allocation3 + $0xa]]  ;;  %s46_s4 = scalar_lea.vmem [#allocation4], %s129_s22 }
  0x1e   :  { %44 = vst.msk [vmem:[#allocation7 + $0x3] sm:$0x1] %vm31_vm0, %v43_v3  ;;  %v47_v4 = vld [vmem:[%s46_s4] sm:$0x1]  ;;  %s136_s5 = sld [smem:[#allocation3 + $0xb]]  ;;  %s50_s6 = scalar_lea.vmem [#allocation4], %s130_s23 }
  0x1f   :  { %48 = vst.msk [vmem:[#allocation7 + $0x4] sm:$0x1] %vm31_vm0, %v47_v4  ;;  %v51_v5 = vld [vmem:[%s50_s6] sm:$0x1]  ;;  %s137_s7 = sld [smem:[#allocation3 + $0xc]]  ;;  %s54_s8 = scalar_lea.vmem [#allocation4], %s131_s24 }
  0x20   :  { %52 = vst.msk [vmem:[#allocation7 + $0x5] sm:$0x1] %vm31_vm0, %v51_v5  ;;  %v55_v6 = vld [vmem:[%s54_s8] sm:$0x1]  ;;  %s138_s9 = sld [smem:[#allocation3 + $0xd]]  ;;  %s58_s10 = scalar_lea.vmem [#allocation4], %s132_s26 }
  0x21   :  { %56 = vst.msk [vmem:[#allocation7 + $0x6] sm:$0x1] %vm31_vm0, %v55_v6  ;;  %v59_v7 = vld [vmem:[%s58_s10] sm:$0x1]  ;;  %s139_s11 = sld [smem:[#allocation3 + $0xe]]  ;;  %s62_s12 = scalar_lea.vmem [#allocation4], %s133_s28 }
  0x22   :  { %60 = vst.msk [vmem:[#allocation7 + $0x7] sm:$0x1] %vm31_vm0, %v59_v7  ;;  %v63_v8 = vld [vmem:[%s62_s12] sm:$0x1]  ;;  %s140_s13 = sld [smem:[#allocation3 + $0xf]]  ;;  %s66_s14 = scalar_lea.vmem [#allocation4], %s134_s29 }
  0x23   :  { %64 = vst.msk [vmem:[#allocation7 + $0x8] sm:$0x1] %vm31_vm0, %v63_v8  ;;  %v67_v9 = vld [vmem:[%s66_s14] sm:$0x1]  ;;  %s70_s0 = scalar_lea.vmem [#allocation4], %s135_s3  ;;  %s204_s18 = smov [#allocation7]  }
  0x24   :  { %68 = vst.msk [vmem:[#allocation7 + $0x9] sm:$0x1] %vm31_vm0, %v67_v9  ;;  %v71_v10 = vld [vmem:[%s70_s0] sm:$0x1]  ;;  %s74_s17 = scalar_lea.vmem [#allocation4], %s136_s5  ;;  %s98_s19 = sshll.u32 %s204_s18, 4  ;;  %s99_s19 = int_to_ptr.vmem [resolvable:$true] %s98_s19 }
  0x25   :  { %72 = vst.msk [vmem:[#allocation7 + $0xa] sm:$0x1] %vm31_vm0, %v71_v10  ;;  %v75_v11 = vld [vmem:[%s74_s17] sm:$0x1]  ;;  %s78_s20 = scalar_lea.vmem [#allocation4], %s137_s7  ;;  %s174_s24 = scalar_lea.vmem %s99_s19, 256 }
  0x26   :  { %76 = vst.msk [vmem:[#allocation7 + $0xb] sm:$0x1] %vm31_vm0, %v75_v11  ;;  %v79_v12 = vld [vmem:[%s78_s20] sm:$0x1]  ;;  %s82_s21 = scalar_lea.vmem [#allocation4], %s138_s9  ;;  %p175_p5 = scmp.ne.s32.totalorder %s99_s19, %s174_s24 }
  0x27   :  { %80 = vst.msk [vmem:[#allocation7 + $0xc] sm:$0x1] %vm31_vm0, %v79_v12  ;;  %v83_v13 = vld [vmem:[%s82_s21] sm:$0x1]  ;;  %s86_s22 = scalar_lea.vmem [#allocation4], %s139_s11  ;;  %p179_p6 = scmp.lt.s32.totalorder %s99_s19, %s99_s19 }
  0x28   :  { %84 = vst.msk [vmem:[#allocation7 + $0xd] sm:$0x1] %vm31_vm0, %v83_v13  ;;  %v87_v14 = vld [vmem:[%s86_s22] sm:$0x1]  ;;  %s90_s23 = scalar_lea.vmem [#allocation4], %s140_s13  ;;  %p180_p7 = scmp.lt.s32.totalorder %s174_s24, %s174_s24 }
  0x29   :  { %88 = vst.msk [vmem:[#allocation7 + $0xe] sm:$0x1] %vm31_vm0, %v87_v14  ;;  %v91_v15 = vld [vmem:[%s90_s23] sm:$0x1] }
  0x2a   :  { %92 = vst.msk [vmem:[#allocation7 + $0xf] sm:$0x1] %vm31_vm0, %v91_v15  ;;  %p181_p8 = por %p180_p7, %p179_p6 }
  0x2c   :  { %p182_p9 = pnand %p181_p8, %p175_p5 }
  0x2e   :  { %185 = shalt.err (!%p182_p9)
}
  0x2f   :  { %104 = dma.vmem_to_hbm [thread:$0]  %s99_s19, 256, %s253_s2, [#allocation6], %s202_s15, %s202_s15, %s203_s16  }
  0x30   :  { %198 = dma.done.wait [#allocation6], 256  }
  0x31   :  { %199 = vsyncadd [#allocation6], 4294967040 }
  0x32   :  { %108 = vsyncpa [#allocation5], 1 }
  0x33   :  { %109 = vsyncpa [#allocation6], 1 }

</bundles_post_ra>
